<compile_context>
chip_gen: v5e
topology: v5e:2x2
jax: 0.10.0
libtpu: 0.0.40
codegen_flags: <defaults>
</compile_context>

<pallas_src>
import jax
import jax.numpy as jnp
from jax import lax
from jax.experimental import pallas as pl
from jax.experimental.pallas import tpu as pltpu


_MXU_DTYPE = jnp.float32   # set to jnp.bfloat16 on v6e/v7x for ~3x MXU throughput (validate accuracy)


# --------------------------------------------------------------------------------------
# shared in-kernel helpers
# --------------------------------------------------------------------------------------

def _elu(v):
    return jnp.where(v > 0, v, jnp.exp(jnp.minimum(v, 0.0)) - 1.0)


def _raw_splits(x, a0, a1, a2):
    """The 4 ELU splits of ReLUSplitNorm (before BatchNorm)."""
    return (_elu(x - a2),
            _elu(a2 - a1 - _elu(a2 - x)),
            _elu(a1 - a0 - _elu(a1 - x)),
            -_elu(a0 - x))


# --------------------------------------------------------------------------------------
# Pallas kernels
# --------------------------------------------------------------------------------------

def _bucket_sums_kernel(centers_ref, x_ref, o_ref):
    """Tiled bucket sums for ReLUSplitNorm.mean_split.

    centers_ref: SMEM (4,) split centers.
    x_ref:       VMEM (br, 128) tile of the flattened input.
    o_ref:       VMEM (3, 128) resident accumulator (lane-partial sums per bucket).
    torch.diff on a bool tensor is XOR -> mask_k = (x < c_{k+1}) != (x < c_k).
    """
    @pl.when(pl.program_id(0) == 0)
    def _():
        o_ref[...] = jnp.zeros_like(o_ref)

    x = x_ref[...]
    lt = [x < centers_ref[k] for k in range(4)]          # 4 compares, reused (not 6)
    rows = []
    for k in range(3):
        m = lt[k + 1] != lt[k]
        rows.append(jnp.sum(jnp.where(m, x, 0.0), axis=0, keepdims=True))
    o_ref[...] += jnp.concatenate(rows, axis=0)


def _split_moments_kernel(scal_ref, mask_ref, x_ref, o_ref):
    """BatchNorm pass 1: per-(split, channel) sum / sum-of-squares of the ELU splits.

    scal_ref: SMEM (3,) = [avg0, avg1, avg2]
    mask_ref: VMEM (1, Lpad) 1.0 on real pixels (excludes conv padding ring + lane tail)
    x_ref:    VMEM (1, Cin, Lpad) channel-major padded block of sample n
    o_ref:    VMEM (2, 4, Cin, 1) resident accumulator: [0]=sum, [1]=sum of squares
    """
    @pl.when(pl.program_id(0) == 0)
    def _():
        o_ref[...] = jnp.zeros_like(o_ref)

    x = x_ref[0]
    mask = mask_ref[...]
    raw = _raw_splits(x, scal_ref[0], scal_ref[1], scal_ref[2])
    for i in range(4):
        s = raw[i] * mask
        o_ref[0, i, :, :] += jnp.sum(s, axis=1, keepdims=True)
        o_ref[1, i, :, :] += jnp.sum(s * raw[i], axis=1, keepdims=True)


def _make_fused_kernel(k, wp, lpad, cout, ln_count):
    """Fused split + BN + SplitConv2d + layer-norm + residual kernel, grid = (N,)."""
    p = k // 2
    inv_ln = 1.0 / float(ln_count)

    def kernel(scal_ref, bnsc_ref, bnsh_ref, mask_ref,
               ws_ref, wz_ref, wres_ref, a2_ref, x_ref, y_ref):
        a0, a1, a2c = scal_ref[0], scal_ref[1], scal_ref[2]
        alpha1, conv_m = scal_ref[3], scal_ref[4]
        nscale, cross_s = scal_ref[5], scal_ref[6]

        x = x_ref[0]                       # (Cin, Lpad) channel-major, zero padded + lane tail
        mask = mask_ref[...]               # (1, Lpad) 1.0 on real pixels

        # --- ELU split + folded BatchNorm, zeroed on the conv padding ring ----------------
        raw = _raw_splits(x, a0, a1, a2c)
        splits = []
        for i in range(4):
            v = raw[i] * bnsc_ref[i] + bnsh_ref[i]       # (Cin,1) per-channel scale/shift
            splits.append(v * mask)
        zsum = splits[0] + splits[1] + splits[2] + splits[3]

        # --- in-VMEM "im2col": one lane-roll per conv tap ---------------------------------
        def shifted(v, t):
            d = (t // k - p) * wp + (t % k - p)          # flat tap offset on the padded grid
            if d == 0:
                return v
            return pltpu.roll(v, (-d) % lpad, axis=1)

        def conv_taps(weight_of_tap, v):
            acc = None
            for t in range(k * k):
                c = jnp.dot(weight_of_tap(t), shifted(v, t).astype(_MXU_DTYPE),
                            preferred_element_type=jnp.float32)
                acc = c if acc is None else acc + c
            return acc                                   # (4*Cout, Lpad), lane-dense

        # --- res_layer_norm: conv_m*t + nscale*LayerNorm over the real (Cout,H,W) block ---
        def rln(t):
            mu = jnp.sum(t * mask) * inv_ln
            var = jnp.sum(((t - mu) ** 2) * mask) * inv_ln
            return conv_m * t + nscale * (t - mu) * lax.rsqrt(var + 1e-5)

        # residual path (1x1 conv, or res_momentum*x folded into wres by the wrapper)
        y = jnp.dot(wres_ref[...].astype(_MXU_DTYPE), x.astype(_MXU_DTYPE),
                    preferred_element_type=jnp.float32)

        # shared cross term: conv4_i(z) for all 4 splits, stacked along MXU rows
        accz = conv_taps(lambda t: wz_ref[t].astype(_MXU_DTYPE), zsum)

        for i in range(4):                               # split axis unrolled in the body
            acc = conv_taps(lambda t, i=i: ws_ref[i, t].astype(_MXU_DTYPE), splits[i])
            c1 = acc[0:cout]
            c2 = acc[cout:2 * cout]
            c3 = acc[2 * cout:3 * cout]
            c4x = acc[3 * cout:4 * cout]
            c4 = cross_s * (accz[i * cout:(i + 1) * cout] - c4x)
            term_a = c1 * (alpha1 * c2 + a2_ref[...])
            term_b = c3 * c4
            y = y + rln(term_a) + rln(term_b)

        y_ref[0] = y                                     # single lane-dense store per sample

    return kernel


# --------------------------------------------------------------------------------------
# JAX glue
# --------------------------------------------------------------------------------------

def _round_up(a, b):
    return (a + b - 1) // b * b


def _bucket_means(xf, centers):
    mtot = xf.size
    assert mtot % 128 == 0, "flattened input must be a multiple of 128 for the bucket kernel"
    rows = mtot // 128
    x2d = xf.reshape(rows, 128)
    br = 8 if rows % 8 == 0 else rows
    partial = pl.pallas_call(
        _bucket_sums_kernel,
        grid=(rows // br,),
        in_specs=[pl.BlockSpec(memory_space=pltpu.MemorySpace.SMEM),
                  pl.BlockSpec((br, 128), lambda i: (i, 0))],
        out_specs=pl.BlockSpec((3, 128), lambda i: (0, 0)),
        out_shape=jax.ShapeDtypeStruct((3, 128), jnp.float32),
        compiler_params=pltpu.CompilerParams(dimension_semantics=("arbitrary",)),
    )(centers, x2d)
    # torch.mean over dim 0 of (M, 3) divides by the TOTAL count, not per-bucket counts.
    return jnp.sum(partial, axis=1) / mtot


def _tap_major(w):
    # (4, Cout, Cin, k, k) -> (4, k*k, Cout, Cin), tap index t = kh*k + kw
    s, co, ci, kh, kw = w.shape
    return jnp.transpose(w, (0, 3, 4, 1, 2)).reshape(s, kh * kw, co, ci)


def meta_res_conv2d_forward(x_nchw, params):
    x_nchw = x_nchw.astype(jnp.float32)
    N, Cin, H, W = x_nchw.shape
    k = params["w1"].shape[-1]
    p = k // 2
    Cout = params["w1"].shape[1]
    Hp, Wp = H + 2 * p, W + 2 * p
    L = Hp * Wp
    Lpad = _round_up(L, 128)
    norm_scale = jnp.float32(params["norm_scale"])

    # ---- ReLUSplitNorm split statistics ----------------------------------------------
    # TODO(synk): torch.quantile is sort-based and has no clean Pallas equivalent; done in JAX.
    xf = x_nchw.reshape(-1)
    centers = jnp.quantile(xf, jnp.linspace(0.0, 1.0, 4)).astype(jnp.float32)
    avg = _bucket_means(xf, centers)                       # pass 1 (tiled Pallas reduction)
    centers2 = jnp.stack([centers[0], (avg[0] + avg[1]) * 0.5,
                          (avg[1] + avg[2]) * 0.5, centers[3]]).astype(jnp.float32)
    avg = _bucket_means(xf, centers2)                      # pass 2

    # ---- channel-major, spatially padded, lane-aligned activation ---------------------
    x_pad = jnp.pad(x_nchw, ((0, 0), (0, 0), (p, p), (p, p))).reshape(N, Cin, L)
    x_cm = jnp.pad(x_pad, ((0, 0), (0, 0), (0, Lpad - L)))                 # (N, Cin, Lpad)
    mask = jnp.pad(jnp.pad(jnp.ones((H, W), jnp.float32),
                           ((p, p), (p, p))).reshape(1, L),
                   ((0, 0), (0, Lpad - L)))                                 # (1, Lpad)

    split_scal = jnp.stack([avg[0], avg[1], avg[2]]).astype(jnp.float32)

    # ---- BatchNorm batch statistics of the 4 splits (two-pass BN, pass 1) -------------
    mom = pl.pallas_call(
        _split_moments_kernel,
        grid=(N,),
        in_specs=[pl.BlockSpec(memory_space=pltpu.MemorySpace.SMEM),
                  pl.BlockSpec((1, Lpad), lambda n: (0, 0)),
                  pl.BlockSpec((1, Cin, Lpad), lambda n: (n, 0, 0))],
        out_specs=pl.BlockSpec((2, 4, Cin, 1), lambda n: (0, 0, 0, 0)),
        out_shape=jax.ShapeDtypeStruct((2, 4, Cin, 1), jnp.float32),
        compiler_params=pltpu.CompilerParams(dimension_semantics=("arbitrary",)),
    )(split_scal, mask, x_cm)

    cnt = float(N * H * W)
    mean = mom[0, :, :, 0] / cnt                                           # (4, Cin)
    var = jnp.maximum(mom[1, :, :, 0] / cnt - mean * mean, 0.0)
    inv_std = lax.rsqrt(var + 1e-5)
    # fold "nm_i * v + norm_scale * (v - mean) * inv_std" into one scale/shift per (split, chan)
    bn_scale = (params["norm_momentum"][:, None] + norm_scale * inv_std)[..., None]  # (4,Cin,1)
    bn_shift = (-norm_scale * inv_std * mean)[..., None]                              # (4,Cin,1)

    # ---- stacked conv weights (VMEM-resident across the whole grid) -------------------
    w1t, w3t, w4t = _tap_major(params["w1"]), _tap_major(params["w3"]), _tap_major(params["w4"])
    center = p * k + p
    w2t = jnp.zeros_like(w1t).at[:, center].set(params["w2"][:, :, :, 0, 0])
    Ws = jnp.concatenate([w1t, w2t, w3t, w4t], axis=2)     # (4, k*k, 4*Cout, Cin)
    Wz = jnp.transpose(w4t, (1, 0, 2, 3)).reshape(k * k, 4 * Cout, Cin)
    if params["wres"] is not None:                         # Cin != Cout: real 1x1 conv
        Wres = params["wres"][:, :, 0, 0]
    else:                                                  # else res_momentum[0] * x as a matmul
        Wres = params["res_momentum"][0] * jnp.eye(Cin, dtype=jnp.float32)
    alpha2 = params["alpha2"].reshape(Cout, 1)

    conv_scal = jnp.stack([avg[0], avg[1], avg[2], params["alpha1"],
                           params["conv_momentum"], norm_scale,
                           params["cross_momentum"][0] / 3.0]).astype(jnp.float32)

    # ---- fused split / BN / conv / layer-norm / residual kernel -----------------------
    kernel = _make_fused_kernel(k, Wp, Lpad, Cout, Cout * H * W)
    y_pad = pl.pallas_call(
        kernel,
        grid=(N,),
        in_specs=[
            pl.BlockSpec(memory_space=pltpu.MemorySpace.SMEM),                 # scalars
            pl.BlockSpec((4, Cin, 1), lambda n: (0, 0, 0)),                    # bn_scale
            pl.BlockSpec((4, Cin, 1), lambda n: (0, 0, 0)),                    # bn_shift
            pl.BlockSpec((1, Lpad), lambda n: (0, 0)),                         # interior mask
            pl.BlockSpec((4, k * k, 4 * Cout, Cin), lambda n: (0, 0, 0, 0)),   # Ws (resident)
            pl.BlockSpec((k * k, 4 * Cout, Cin), lambda n: (0, 0, 0)),         # Wz (resident)
            pl.BlockSpec((Cout, Cin), lambda n: (0, 0)),                       # Wres
            pl.BlockSpec((Cout, 1), lambda n: (0, 0)),                         # alpha2
            pl.BlockSpec((1, Cin, Lpad), lambda n: (n, 0, 0)),                 # x (per sample)
        ],
        out_specs=pl.BlockSpec((1, Cout, Lpad), lambda n: (n, 0, 0)),
        out_shape=jax.ShapeDtypeStruct((N, Cout, Lpad), jnp.float32),
        compiler_params=pltpu.CompilerParams(dimension_semantics=("parallel",)),
    )(conv_scal, bn_scale, bn_shift, mask, Ws, Wz, Wres, alpha2, x_cm)

    # lane-dense (N, Cout, Lpad) -> NCHW by cropping the conv padding ring (no transpose)
    y = y_pad[:, :, :L].reshape(N, Cout, Hp, Wp)[:, :, p:p + H, p:p + W]
    return y


def init_params(key, in_channels, out_channels, norm_scale, kernels):
    ks = jax.random.split(key, 5)

    def uw(kk, shape, fan_in):
        bound = 1.0 / (fan_in ** 0.5)
        return jax.random.uniform(kk, shape, jnp.float32, -bound, bound)

    fan3 = in_channels * kernels * kernels
    fan1 = in_channels
    return dict(
        w1=uw(ks[0], (4, out_channels, in_channels, kernels, kernels), fan3),
        w2=uw(ks[1], (4, out_channels, in_channels, 1, 1), fan1),
        w3=uw(ks[2], (4, out_channels, in_channels, kernels, kernels), fan3),
        w4=uw(ks[3], (4, out_channels, in_channels, kernels, kernels), fan3),
        wres=(uw(ks[4], (out_channels, in_channels, 1, 1), fan1)
              if in_channels != out_channels else None),
        norm_momentum=jnp.zeros((4,), jnp.float32),        # norm_momentum1..4 init to 0.0
        cross_momentum=jnp.ones((4,), jnp.float32),
        res_momentum=jnp.ones((4,), jnp.float32),
        conv_momentum=jnp.float32(1.0),
        alpha1=jnp.float32(1.0),
        alpha2=jnp.ones((out_channels, 1, 1), jnp.float32),
        norm_scale=float(norm_scale),
    )


if __name__ == "__main__":
    key = jax.random.PRNGKey(0)
    kx, kp = jax.random.split(key)
    N, Cin, Cout, H, W, kernels = 2, 4, 8, 16, 16, 3
    x = jax.random.normal(kx, (N, Cin, H, W), jnp.float32)
    params = init_params(kp, Cin, Cout, norm_scale=0.1, kernels=kernels)

    out = meta_res_conv2d_forward(x, params)
    out = jax.block_until_ready(out)

    assert out.shape == (N, Cout, H, W), out.shape
    assert bool(jnp.all(jnp.isfinite(out)))
    print("KERNEL_OK")
</pallas_src>

<mosaic_0001>
module attributes {stable_mosaic.version = 11 : i64} {
  func.func @_bucket_sums_kernel(%arg0: i32, %arg1: memref<4xf32, #tpu.memory_space<smem>>, %arg2: memref<8x128xf32, #tpu.memory_space<vmem>>, %arg3: memref<3x128xf32, #tpu.memory_space<vmem>>) attributes {dimension_semantics = [#tpu.dimension_semantics<arbitrary>], iteration_bounds = array<i64: 2>, scalar_prefetch = 0 : i64, scratch_operands = 0 : i64, tpu.core_type = #tpu.core_type<tc>, window_params = [{transform_indices = @transform_0, window_bounds = array<i64: 4>}, {transform_indices = @transform_1, window_bounds = array<i64: 8, 128>}, {pipeline_mode = #tpu.pipeline_mode<synchronous>, transform_indices = @transform_2, window_bounds = array<i64: 3, 128>}]} {
    %c0_i32 = arith.constant 0 : i32
    %0 = arith.cmpi eq, %arg0, %c0_i32 : i32
    %1 = arith.extui %0 : i1 to i32
    %c0_i32_0 = arith.constant 0 : i32
    %2 = arith.cmpi ne, %1, %c0_i32_0 : i32
    scf.if %2 {
      %cst_12 = arith.constant 0.000000e+00 : f32
      %35 = vector.broadcast %cst_12 : f32 to vector<3x128xf32>
      %c0_13 = arith.constant 0 : index
      %c0_14 = arith.constant 0 : index
      %36 = vector.load %arg3[%c0_13, %c0_14] : memref<3x128xf32, #tpu.memory_space<vmem>>, vector<3x128xf32>
      tpu.vector_store %arg3[%c0_13, %c0_14], %35 {strides = array<i32>} : memref<3x128xf32, #tpu.memory_space<vmem>>, vector<3x128xf32>,
    } else {
    }
    %c0 = arith.constant 0 : index
    %c0_1 = arith.constant 0 : index
    %3 = vector.load %arg2[%c0, %c0_1] : memref<8x128xf32, #tpu.memory_space<vmem>>, vector<8x128xf32>
    %c0_2 = arith.constant 0 : index
    %4 = memref.load %arg1[%c0_2] : memref<4xf32, #tpu.memory_space<smem>>
    %5 = vector.broadcast %4 : f32 to vector<8x128xf32>
    %6 = arith.cmpf olt, %3, %5 : vector<8x128xf32>
    %c1 = arith.constant 1 : index
    %7 = memref.load %arg1[%c1] : memref<4xf32, #tpu.memory_space<smem>>
    %8 = vector.broadcast %7 : f32 to vector<8x128xf32>
    %9 = arith.cmpf olt, %3, %8 : vector<8x128xf32>
    %c2 = arith.constant 2 : index
    %10 = memref.load %arg1[%c2] : memref<4xf32, #tpu.memory_space<smem>>
    %11 = vector.broadcast %10 : f32 to vector<8x128xf32>
    %12 = arith.cmpf olt, %3, %11 : vector<8x128xf32>
    %c3 = arith.constant 3 : index
    %13 = memref.load %arg1[%c3] : memref<4xf32, #tpu.memory_space<smem>>
    %14 = vector.broadcast %13 : f32 to vector<8x128xf32>
    %15 = arith.cmpf olt, %3, %14 : vector<8x128xf32>
    %16 = arith.xori %9, %6 : vector<8x128xi1>
    %cst = arith.constant 0.000000e+00 : f32
    %17 = vector.broadcast %cst : f32 to vector<8x128xf32>
    %18 = arith.select %16, %3, %17 : vector<8x128xi1>, vector<8x128xf32>
    %cst_3 = arith.constant dense<0.000000e+00> : vector<128xf32>
    %19 = vector.multi_reduction <add>, %18, %cst_3 [0] : vector<8x128xf32> to vector<128xf32>
    %20 = vector.shape_cast %19 : vector<128xf32> to vector<1x128xf32>
    %21 = arith.xori %12, %9 : vector<8x128xi1>
    %cst_4 = arith.constant 0.000000e+00 : f32
    %22 = vector.broadcast %cst_4 : f32 to vector<8x128xf32>
    %23 = arith.select %21, %3, %22 : vector<8x128xi1>, vector<8x128xf32>
    %cst_5 = arith.constant dense<0.000000e+00> : vector<128xf32>
    %24 = vector.multi_reduction <add>, %23, %cst_5 [0] : vector<8x128xf32> to vector<128xf32>
    %25 = vector.shape_cast %24 : vector<128xf32> to vector<1x128xf32>
    %26 = arith.xori %15, %12 : vector<8x128xi1>
    %cst_6 = arith.constant 0.000000e+00 : f32
    %27 = vector.broadcast %cst_6 : f32 to vector<8x128xf32>
    %28 = arith.select %26, %3, %27 : vector<8x128xi1>, vector<8x128xf32>
    %cst_7 = arith.constant dense<0.000000e+00> : vector<128xf32>
    %29 = vector.multi_reduction <add>, %28, %cst_7 [0] : vector<8x128xf32> to vector<128xf32>
    %30 = vector.shape_cast %29 : vector<128xf32> to vector<1x128xf32>
    %c0_8 = arith.constant 0 : index
    %c0_9 = arith.constant 0 : index
    %31 = vector.load %arg3[%c0_8, %c0_9] : memref<3x128xf32, #tpu.memory_space<vmem>>, vector<3x128xf32>
    %32 = tpu.concatenate %20, %25, %30 in 0 : vector<1x128xf32>, vector<1x128xf32>, vector<1x128xf32> -> vector<3x128xf32>
    %33 = arith.addf %31, %32 : vector<3x128xf32>
    %c0_10 = arith.constant 0 : index
    %c0_11 = arith.constant 0 : index
    %34 = vector.load %arg3[%c0_10, %c0_11] : memref<3x128xf32, #tpu.memory_space<vmem>>, vector<3x128xf32>
    tpu.vector_store %arg3[%c0_10, %c0_11], %33 {strides = array<i32>} : memref<3x128xf32, #tpu.memory_space<vmem>>, vector<3x128xf32>,
    return
  }
  func.func @transform_0(%arg0: i32) -> i32 {
    %c0_i32 = arith.constant 0 : i32
    %c0_i32_0 = arith.constant 0 : i32
    return %c0_i32 : i32
  }
  func.func @transform_1(%arg0: i32) -> (i32, i32) {
    %c0_i32 = arith.constant 0 : i32
    %c0_i32_0 = arith.constant 0 : i32
    return %arg0, %c0_i32 : i32, i32
  }
  func.func @transform_2(%arg0: i32) -> (i32, i32) {
    %c0_i32 = arith.constant 0 : i32
    %c0_i32_0 = arith.constant 0 : i32
    %c0_i32_1 = arith.constant 0 : i32
    return %c0_i32, %c0_i32_0 : i32, i32
  }
}

</mosaic_0001>

<bundles_post_ra>
// kernel: tpu_custom_call.1
= control target key start
LH: loop header
LB: loop body
LE: loop exit
PB: predicated region body
PF: predicated region fallthrough
CT: control target
= control target key end

     0   :  { %7 = vsyncpa [#allocation5], 0  ;;  %s598_s0 = inlined_call_operand.hbm [shape: f32[4], index: 0, kind: input, shape index: {}]   ;;  %s599_s1 = inlined_call_operand.hbm [shape: f32[16,128], index: 1, kind: input, shape index: {}]   ;;  %s600_s2 = inlined_call_operand.hbm [shape: f32[3,128], index: 2, kind: output, shape index: {}]  }
   0x1   :  { %8 = vsyncpa [#allocation3], 0 }
   0x2   :  { %10 = vsyncpa [#allocation3 + $0x1], 0 }
   0x3   :  { %11 = vsyncpa [#allocation4], 0  ;;  %s493_s9 = smov 0   ;;  %s495_s10 = smov 0  }
   0x4   :  { %s497_s11 = smov 0   ;;  %s499_s12 = smov 0  }
   0x5 LB: > { %s512_s13 = sadd.s32 4294967295, %s473_s12   ;;  %p58_p0 = scmp.ne.s32.totalorder %s465_s10, %s461_s9  ;;  %s473_s12 = sphi %s499_s12, %s607_s12   ;;  %s469_s11 = sphi %s497_s11, %s606_s11   ;;  %s465_s10 = sphi %s495_s10, %s605_s10   ;;  %s461_s9 = sphi %s493_s9, %s604_s9  }
   0x6   : > { %p59_p1 = scmp.eq.s32.totalorder %s512_s13, 0  ;;  %p284_p2 = scmp.ge.s32.totalorder %s473_s12, 1 }
   0x7   : > { %p90_p3 = scmp.lt.s32.totalorder %s473_s12, 3  ;;  %p285_p4 = scmp.ne.s32.totalorder %s512_s13, 0 }
   0x8   : > { %p521_p5 = por %p59_p1, %p58_p0  ;;  %s102_s17 = sshll.u32 %s598_s0, 4  ;;  %s103_s17 = int_to_ptr.hbm [resolvable:$true] %s102_s17 }
   0x9   : > { %p528_p6 = pnand %p284_p2, %p90_p3  ;;  %s535_s19 = sadd.s32 1, %s473_s12  }
   0xa   : > { %s42_s20 = ssub.s32 %s473_s12, %s535_s19  ;;  %s45_s21 = sadd.s32 1, %s469_s11 }
   0xb   : > { %p310_p7 = pneg %p528_p6  ;;  %p43_p9 = scmp.eq.s32.totalorder %s42_s20, 0 }
   0xc   : > { %p52_p10 = scmp.ne.s32.totalorder %s469_s11, %s465_s10  ;;  %s475_s22 = smov [#allocation2]  }
   0xd   : > { %p311_p8 = pnand %p310_p7, %p59_p1  ;;  %p53_p11 = scmp.eq.s32.totalorder %s473_s12, 0 }
   0xe   : > { %s545_s23 = scalar_select %p43_p9, %s469_s11, %s45_s21  }
   0xf   : > { %313 = dma.hbm_to_smem (!%p311_p8), %s103_s17, 16, %s475_s22, [#allocation5]  }
  0x10   : > { %p319_p12 = scmp.lt.s32.totalorder %s473_s12, 2  ;;  %s113_s24 = sand.u32 1, %s469_s11  }
  0x11   : > { %s288_s25 = sshll.u32 %s473_s12, 3  ;;  %p54_p13 = por %p53_p11, %p52_p10 }
  0x12   : > { %s287_s26 = sshll.u32 %s113_s24, 3  ;;  %s121_s29 = scalar_lea.hbm %s599_s1, %s288_s25 }
  0x13   : > { %s123_s30 = sshll.u32 %s121_s29, 4  ;;  %s117_s3 = scalar_lea.vmem [#allocation6], %s287_s26  ;;  %s124_s30 = int_to_ptr.hbm [resolvable:$true] %s123_s30 }
  0x14   : > { %s125_s4 = sshll.u32 %s117_s3, 4  ;;  %p554_p0 = pnand %p319_p12, %p54_p13  ;;  %s126_s4 = int_to_ptr.vmem [resolvable:$true] %s125_s4 }
  0x15   : > { %s114_s6 = scalar_lea.sflag [#allocation3], %s113_s24  ;;  %s373_s7 = sshra.s32 %s124_s30, 4  ;;  %s374_s7 = int_to_ptr.hbm [resolvable:$true] %s373_s7 }
  0x16   : > { %s375_s8 = scalar_lea.hbm %s374_s7, 8  ;;  %p377_p3 = pneg %p554_p0 }
  0x17   : > { %p376_p2 = scmp.ne.s32.totalorder %s374_s7, %s375_s8  ;;  %s380_s15 = scalar_lea.hbm %s599_s1, 16 }
  0x18   : > { %p381_p9 = scmp.lt.s32.totalorder %s374_s7, %s599_s1  ;;  %p382_p10 = scmp.lt.s32.totalorder %s380_s15, %s375_s8 }
  0x19   : > { %p378_p7 = pnand %p377_p3, %p376_p2 }
  0x1a   : > { %p383_p11 = por %p382_p10, %p381_p9 }
  0x1b   : > { %p379_p8 = pneg %p378_p7 }
  0x1d   : > { %p384_p12 = pnand %p383_p11, %p379_p8 }
  0x1f   : > { %387 = shalt.err (!%p384_p12)
}
  0x20   : > { %317 = dma.hbm_to_vmem [thread:$0]  (!%p554_p0), %s124_s30, 128, %s126_s4, %s114_s6  }
  0x21   : > { %134 = sbr.rel (%p528_p6) target bundleno = 84 (0x54), region = 28 }
  0x26   : > { %448 = dma.done.wait (%p59_p1), [#allocation5], 16  }
  0x27   : > { %450 = vsyncadd (%p59_p1), [#allocation5], 4294967280  ;;  %s141_s20 = sand.u32 1, %s465_s10  }
  0x28   : > { %s291_s21 = sshll.u32 %s141_s20, 3  ;;  %s142_s22 = scalar_lea.sflag [#allocation3], %s141_s20 }
  0x29   : > { %s145_s24 = scalar_lea.vmem [#allocation6], %s291_s21 }
  0x2a   : > { %452 = dma.done.wait (%p521_p5), %s142_s22, 128  }
  0x2b   : > { %454 = vsyncadd (%p521_p5), %s142_s22, 4294967168 }
  0x2c   : > { %151 = sfence }
  0x2d   : > { %166 = sbr.rel (%p285_p4) target bundleno = 52 (0x34), region = 40 }
  0x32   : > { %v476_v0 = vmov 0.0  }
  0x33   : > { %167 = vst [vmem:[#allocation7] sm:$0x7] %v476_v0 }
  0x34 PF: > { %s169_s18 = sld [smem:[#allocation2]]  ;;  %v168_v1 = vld [vmem:[%s145_s24] sm:$0xff]  ;;  %vm206_vm7 = vcmask 1040384   ;;  %vm208_vm8 = vcmask 1041408   ;;  %s477_s14 = smov [#allocation7]  }
  0x35   : > { %s293_s25 = sld [smem:[#allocation2 + $0x1]]  ;;  %s218_s28 = sshll.u32 %s477_s14, 4  ;;  %s219_s28 = int_to_ptr.vmem [resolvable:$true] %s218_s28 }
  0x36   : > { %s294_s26 = sld [smem:[#allocation2 + $0x2]]  ;;  %s220_s3 = sshll.u32 %s600_s2, 4  ;;  %s221_s3 = int_to_ptr.hbm [resolvable:$true] %s220_s3 }
  0x37   : > { %s295_s27 = sld [smem:[#allocation2 + $0x3]]  ;;  %p321_p1 = scmp.eq.s32.totalorder %s512_s13, 1 }
  0x3a   : > { %v170_v2 = vstv %s169_s18  ;;  %v205_v27 = vld [vmem:[#allocation7] sm:$0x7] }
  0x3b   : > { %vm171_vm0 = vcmp.lt.f32.partialorder %v168_v1, %v170_v2  ;;  %v173_v3 = vstv %s293_s25 }
  0x3c   : > { %vm174_vm1 = vcmp.lt.f32.partialorder %v168_v1, %v173_v3  ;;  %v176_v4 = vstv %s294_s26 }
  0x3d   : > { %vm177_vm2 = vcmp.lt.f32.partialorder %v168_v1, %v176_v4  ;;  %v179_v5 = vstv %s295_s27  ;;  %vm181_vm3 = vmxor %vm174_vm1, %vm171_vm0 }
  0x3e   : > { %vm180_vm4 = vcmp.lt.f32.partialorder %v168_v1, %v179_v5  ;;  %v182_v6 = vsel %vm181_vm3, %v168_v1, 0.0  ;;  %vm189_vm5 = vmxor %vm177_vm2, %vm174_vm1 }
  0x3f   : > { %v183_v7 = vrot.slane %v182_v6, 4  ;;  %v190_v8 = vsel %vm189_vm5, %v168_v1, 0.0  ;;  %vm197_vm6 = vmxor %vm180_vm4, %vm177_vm2 }
  0x40   : > { %v191_v9 = vrot.slane %v190_v8, 4  ;;  %v198_v10 = vsel %vm197_vm6, %v168_v1, 0.0 }
  0x41   : > { %v184_v11 = vadd.f32 %v183_v7, %v182_v6  ;;  %v199_v12 = vrot.slane %v198_v10, 4 }
  0x42   : > { %v192_v13 = vadd.f32 %v191_v9, %v190_v8 }
  0x43   : > { %v185_v14 = vrot.slane %v184_v11, 2  ;;  %v200_v15 = vadd.f32 %v199_v12, %v198_v10 }
  0x44   : > { %v193_v16 = vrot.slane %v192_v13, 2 }
  0x45   : > { %v186_v17 = vadd.f32 %v185_v14, %v184_v11  ;;  %v201_v18 = vrot.slane %v200_v15, 2 }
  0x46   : > { %v194_v19 = vadd.f32 %v193_v16, %v192_v13 }
  0x47   : > { %v187_v20 = vrot.slane %v186_v17, 1  ;;  %v202_v21 = vadd.f32 %v201_v18, %v200_v15 }
  0x48   : > { %v195_v22 = vrot.slane %v194_v19, 1 }
  0x49   : > { %v188_v23 = vadd.f32 %v187_v20, %v186_v17  ;;  %v203_v24 = vrot.slane %v202_v21, 1 }
  0x4a   : > { %v196_v25 = vadd.f32 %v195_v22, %v194_v19 }
  0x4b   : > { %v204_v26 = vadd.f32 %v203_v24, %v202_v21 }
  0x4c   : > { %v207_v28 = vsel %vm206_vm7, %v188_v23, %v196_v25 }
  0x4d   : > { %v209_v29 = vsel %vm208_vm8, %v207_v28, %v204_v26 }
  0x4e   : > { %v210_v30 = vadd.f32 %v209_v29, %v205_v27 }
  0x50   : > { %211 = vst [vmem:[#allocation7] sm:$0x7] %v210_v30 }
  0x51   : > { %307 = dma.vmem_to_hbm [thread:$0]  (%p321_p1), %s219_s28, 64, %s221_s3, [#allocation4]  }
  0x52   : > { %456 = dma.done.wait (%p321_p1), [#allocation4], 64  }
  0x53   : > { %458 = vsyncadd (%p321_p1), [#allocation4], 4294967232 }
  0x54 PF: > { %p14_p4 = scmp.ge.s32.totalorder %s535_s19, 4   ;;  %s604_s9 = smov %s465_s10 }
  0x55   : > { %s605_s10 = smov %s469_s11  ;;  %s606_s11 = smov %s545_s23 }
  0x56   : > { %s607_s12 = smov %s535_s19  ;;  %16 = sbr.rel (!%p14_p4) target bundleno = 5 (0x5), region = 74 }
  0x5b   :  { %234 = vsyncpa [#allocation3], 1 }
  0x5c   :  { %236 = vsyncpa [#allocation3 + $0x1], 1 }
  0x5d   :  { %237 = vsyncpa [#allocation4], 1 }
  0x5e   :  { %239 = vsyncpa [#allocation4 + $0x1], 1 }
  0x5f   :  { %240 = vsyncpa [#allocation5], 1 }
  0x60   :  { %242 = vsyncpa [#allocation5 + $0x1], 1 }

</bundles_post_ra>
